<compile_context>
chip_gen: v6e
topology: v6e:2x2x1
jax: 0.10.0
libtpu: 0.0.40
codegen_flags: <defaults>
</compile_context>

<pallas_src>
import jax
import jax.numpy as jnp
import numpy as np
from jax.experimental import pallas as pl
from jax.experimental.pallas import tpu as pltpu

_MIB = 1024 * 1024


def _round_up(x, m):
    return (x + m - 1) // m * m


def _vmem_capacity_bytes():
    """Physical VMEM per core; conservative (v7x-sized) fallback."""
    try:
        return int(pltpu.get_tpu_info().vmem_capacity_bytes)
    except Exception:
        return 64 * _MIB


# ----------------------------- uncertainty kernel ---------------------------

_UNCERTAINTY_UNROLL_GROUPS = 8   # fully unroll the channel-group scan below this


def _uncertainty_kernel(x_ref, out_ref):
    """x_ref: (C, T) block; out_ref: (1, T) = top2 - top1 over channels."""
    C, _ = x_ref.shape
    ng = C // 8

    if ng > 0:
        # Vectorized running top-2 over groups of 8 channels (full-vreg loads).
        m1 = x_ref[0:8, :]                          # (8, T) running top1
        m2 = jnp.full_like(m1, -jnp.inf)            # (8, T) running top2

        def gstep(g, carry):
            m1, m2 = carry
            off = pl.multiple_of(g * 8, 8)
            xg = x_ref[pl.ds(off, 8), :]
            # branch-free top-2 update (old m1 on both RHS)
            return (jnp.maximum(m1, xg),
                    jnp.maximum(m2, jnp.minimum(m1, xg)))

        if ng <= _UNCERTAINTY_UNROLL_GROUPS:
            for g in range(1, ng):
                m1, m2 = gstep(g, (m1, m2))
        else:
            m1, m2 = jax.lax.fori_loop(1, ng, gstep, (m1, m2), unroll=4)

        # Butterfly top-2 merge across the 8 sublanes (XLU rolls + VPU min/max).
        # Sets merged at each step are disjoint, so the pair-merge is exact.
        for shift in (4, 2, 1):
            s1 = pltpu.roll(m1, shift=shift, axis=0)
            s2 = pltpu.roll(m2, shift=shift, axis=0)
            m1, m2 = (jnp.maximum(m1, s1),
                      jnp.maximum(jnp.minimum(m1, s1), jnp.maximum(m2, s2)))
        top1 = jnp.max(m1, axis=0, keepdims=True)   # all sublanes equal now
        top2 = jnp.max(m2, axis=0, keepdims=True)
        tail_start = ng * 8
    else:
        top1 = x_ref[0:1, :]
        top2 = jnp.full_like(top1, -jnp.inf)        # stays -inf if C == 1
        tail_start = 1

    # Channel tail (C % 8): at most 7 single-sublane loads.
    for r in range(tail_start, C):
        xr = x_ref[r:r + 1, :]
        top1, top2 = (jnp.maximum(top1, xr),
                      jnp.maximum(top2, jnp.minimum(top1, xr)))

    out_ref[...] = (top2 - top1).astype(out_ref.dtype)


def calculate_uncertainty_pallas(logits, *, vmem_budget_bytes=None):
    """(N, C, H, W) logits -> (N, H*W) uncertainty = top2 - top1 over C."""
    N, C, H, W = logits.shape
    HW = H * W
    itemsize = jnp.dtype(logits.dtype).itemsize

    big_vmem = _vmem_capacity_bytes() >= 96 * _MIB        # v5e/v6e: 128 MiB
    if vmem_budget_bytes is None:
        vmem_budget_bytes = 24 * _MIB if big_vmem else 8 * _MIB
    lane_cap = 32768 if big_vmem else 16384
    vmem_limit = (64 if big_vmem else 32) * _MIB

    hw_pad = _round_up(HW, 128)
    # Largest lane tile (multiple of 128) whose double-buffered (C, tile) input
    # stays under the budget.
    max_tile = max(128, (vmem_budget_bytes // (2 * C * itemsize)) // 128 * 128)
    tile = min(max_tile, hw_pad, lane_cap)
    # Guarantee >=2 "parallel" grid steps where possible (v7x megacore).
    if N * (-(-hw_pad // tile)) < 2 and hw_pad >= 256:
        tile = max(128, (tile // 2) // 128 * 128)
    hw_pad = _round_up(hw_pad, tile)

    x = logits.reshape(N, C, HW)
    if hw_pad != HW:
        x = jnp.pad(x, ((0, 0), (0, 0), (0, hw_pad - HW)))

    out = pl.pallas_call(
        _uncertainty_kernel,
        out_shape=jax.ShapeDtypeStruct((N, 1, hw_pad), logits.dtype),
        grid=(N, hw_pad // tile),
        in_specs=[pl.BlockSpec((pl.Squeezed(), C, tile),
                               lambda n, t: (n, 0, t))],
        out_specs=pl.BlockSpec((pl.Squeezed(), 1, tile),
                               lambda n, t: (n, 0, t)),
        compiler_params=pltpu.CompilerParams(
            dimension_semantics=("parallel", "parallel"),
            vmem_limit_bytes=vmem_limit),
    )(x)
    return out[:, 0, :HW]                                   # (N, H*W)


# ------------------------------- point head ---------------------------------

def _point_head_kernel(fine_ref, coarse_ref,
                       w0f_ref, w1h_ref, w2h_ref, wph_ref,
                       wc_all_ref, b_all_ref, out_ref):
    """StandardPointHead on one (batch, lane-tile) block.

    Concat-free via split weights; all four coarse-side matmuls are merged
    into a single dot computed once per tile.
    """
    f32 = jnp.float32
    cdt = fine_ref.dtype                         # matmul operand dtype
    fine = fine_ref[...]                         # (Cf, T)
    coarse = coarse_ref[...]                     # (Cc, T)
    fc_dim = w1h_ref.shape[0]
    co = out_ref.shape[0]

    # One merged coarse-side matmul for all 3 fc layers + predictor.
    yc = jnp.dot(wc_all_ref[...], coarse, preferred_element_type=f32)  # (3fc+Co, T)
    b_all = b_all_ref[...]                       # (3fc+Co, 1) f32

    def layer(w_ref, h, row0, rows):
        return (jnp.dot(w_ref[...], h, preferred_element_type=f32)
                + yc[row0:row0 + rows, :] + b_all[row0:row0 + rows, :])

    h = jnp.maximum(layer(w0f_ref, fine, 0, fc_dim), 0.0).astype(cdt)
    h = jnp.maximum(layer(w1h_ref, h, fc_dim, fc_dim), 0.0).astype(cdt)
    h = jnp.maximum(layer(w2h_ref, h, 2 * fc_dim, fc_dim), 0.0).astype(cdt)
    out = layer(wph_ref, h, 3 * fc_dim, co)
    out_ref[...] = out.astype(out_ref.dtype)


def pack_point_head_params(params, num_fine_channels):
    """Split fc weights into hidden/coarse column blocks and merge all
    coarse-side blocks (and biases) row-wise, so the kernel needs no in-kernel
    concats and only one coarse-side matmul."""
    fc_dim = params["w0"].shape[0]
    cf = num_fine_channels
    w0, w1, w2, wp = params["w0"], params["w1"], params["w2"], params["wp"]
    return {
        "w0f": w0[:, :cf],
        "w1h": w1[:, :fc_dim],
        "w2h": w2[:, :fc_dim],
        "wph": wp[:, :fc_dim],
        "wc_all": jnp.concatenate(
            [w0[:, cf:], w1[:, fc_dim:], w2[:, fc_dim:], wp[:, fc_dim:]],
            axis=0),
        "b_all": jnp.concatenate(
            [params["b0"], params["b1"], params["b2"], params["bp"]], axis=0),
    }


_BUFFERED_WEIGHTS_OK = [True]     # cache: single-buffered weight specs supported


def point_head_pallas(fine, coarse, packed, *, out_dtype=jnp.float32,
                      compute_dtype=jnp.bfloat16, vmem_budget_bytes=None):
    """fine: (N, Cf, P), coarse: (N, Cc, P) -> (N, num_classes, P)."""
    N, Cf, P = fine.shape
    Cc = coarse.shape[1]
    fc_dim = packed["w1h"].shape[0]
    Co = packed["wph"].shape[0]
    rows_yc = 3 * fc_dim + Co

    big_vmem = _vmem_capacity_bytes() >= 96 * _MIB
    if vmem_budget_bytes is None:
        vmem_budget_bytes = 24 * _MIB if big_vmem else 12 * _MIB
    tile_cap = 4096 if big_vmem else 2048
    vmem_limit = (64 if big_vmem else 32) * _MIB

    cbytes = jnp.dtype(compute_dtype).itemsize
    obytes = jnp.dtype(out_dtype).itemsize
    # Per-lane bytes: double-buffered I/O + live f32/compute-dtype temporaries
    # (merged coarse result yc, hidden h, layer output y).
    per_lane = (2 * cbytes * (Cf + Cc)
                + 2 * obytes * Co
                + 4 * rows_yc
                + (cbytes + 4) * fc_dim)
    weight_bytes = (cbytes * (fc_dim * Cf + 2 * fc_dim * fc_dim + Co * fc_dim
                              + rows_yc * Cc) + 4 * rows_yc)
    budget = max(per_lane * 128, vmem_budget_bytes - 2 * weight_bytes)
    max_tile = max(128, (budget // per_lane) // 128 * 128)

    p_pad = _round_up(P, 128)
    tile = min(max_tile, p_pad, tile_cap)
    # Guarantee >=2 "parallel" grid steps where possible (v7x megacore).
    if N * (-(-p_pad // tile)) < 2 and p_pad >= 256:
        tile = max(128, (tile // 2) // 128 * 128)
    p_pad = _round_up(p_pad, tile)

    def pad_cast(x):                              # (N, C, P) -> (N, C, p_pad)
        if p_pad != P:
            x = jnp.pad(x, ((0, 0), (0, 0), (0, p_pad - P)))
        return x.astype(compute_dtype)

    fine_p = pad_cast(fine)
    coarse_p = pad_cast(coarse)

    weights = [packed["w0f"].astype(compute_dtype),
               packed["w1h"].astype(compute_dtype),
               packed["w2h"].astype(compute_dtype),
               packed["wph"].astype(compute_dtype),
               packed["wc_all"].astype(compute_dtype),
               packed["b_all"].astype(jnp.float32)]     # bias stays f32

    def _call(weight_pipeline_mode):
        def wspec(shape):
            if weight_pipeline_mode is None:
                return pl.BlockSpec(shape, lambda n, t: (0, 0))
            return pl.BlockSpec(shape, lambda n, t: (0, 0),
                                pipeline_mode=weight_pipeline_mode)

        in_specs = ([pl.BlockSpec((pl.Squeezed(), Cf, tile),
                                  lambda n, t: (n, 0, t)),
                     pl.BlockSpec((pl.Squeezed(), Cc, tile),
                                  lambda n, t: (n, 0, t))]
                    + [wspec(w.shape) for w in weights])

        return pl.pallas_call(
            _point_head_kernel,
            out_shape=jax.ShapeDtypeStruct((N, Co, p_pad), out_dtype),
            grid=(N, p_pad // tile),
            in_specs=in_specs,
            out_specs=pl.BlockSpec((pl.Squeezed(), Co, tile),
                                   lambda n, t: (n, 0, t)),
            compiler_params=pltpu.CompilerParams(
                dimension_semantics=("parallel", "parallel"),
                vmem_limit_bytes=vmem_limit),
        )(fine_p, coarse_p, *weights)

    if _BUFFERED_WEIGHTS_OK[0]:
        try:
            out = _call(pl.Buffered(1))   # weights never change across tiles
        except Exception:
            _BUFFERED_WEIGHTS_OK[0] = False
            out = _call(None)
    else:
        out = _call(None)

    return out[:, :, :P]                              # (N, Co, P)


# --------------------------- plain-JAX reference ----------------------------

def calculate_uncertainty_ref(logits):
    top2 = jax.lax.top_k(jnp.moveaxis(logits, 1, -1), 2)[0]   # (N, H, W, 2)
    return (top2[..., 1] - top2[..., 0])[:, None, :, :]


def point_head_ref(fine, coarse, p):
    x = jnp.concatenate([fine, coarse], axis=1)
    for w, b in ((p["w0"], p["b0"]), (p["w1"], p["b1"]), (p["w2"], p["b2"])):
        y = jnp.einsum("oc,ncp->nop", w, x) + b[None]
        x = jnp.concatenate([jnp.maximum(y, 0.0), coarse], axis=1)
    return jnp.einsum("oc,ncp->nop", p["wp"], x) + p["bp"][None]


# ------------------------------- JAX glue -----------------------------------

def point_sample(inp, point_coords):
    """F.grid_sample(inp, 2*coords-1, bilinear, align_corners=False, zeros).

    inp: (N, C, H, W), point_coords: (N, P, 2) in [0,1], last dim = (x, y).
    Returns (N, C, P).
    """
    N, C, H, W = inp.shape
    gx = 2.0 * point_coords[..., 0] - 1.0
    gy = 2.0 * point_coords[..., 1] - 1.0
    ix = ((gx + 1.0) * W - 1.0) / 2.0
    iy = ((gy + 1.0) * H - 1.0) / 2.0
    x0 = jnp.floor(ix)
    y0 = jnp.floor(iy)
    x1 = x0 + 1.0
    y1 = y0 + 1.0
    wx1 = ix - x0
    wx0 = 1.0 - wx1
    wy1 = iy - y0
    wy0 = 1.0 - wy1
    flat = inp.reshape(N, C, H * W)

    def gather(yi, xi):
        valid = ((xi >= 0) & (xi <= W - 1) & (yi >= 0) & (yi <= H - 1))
        xc = jnp.clip(xi, 0, W - 1).astype(jnp.int32)
        yc = jnp.clip(yi, 0, H - 1).astype(jnp.int32)
        idx = yc * W + xc                                          # (N, P)
        vals = jnp.take_along_axis(flat, idx[:, None, :], axis=2)  # (N, C, P)
        return vals * valid.astype(inp.dtype)[:, None, :]

    return (gather(y0, x0) * (wy0 * wx0)[:, None, :]
            + gather(y0, x1) * (wy0 * wx1)[:, None, :]
            + gather(y1, x0) * (wy1 * wx0)[:, None, :]
            + gather(y1, x1) * (wy1 * wx1)[:, None, :])


def point_rend_sem_seg_head_eval(pred_logits, features, params,
                                 subdivision_steps, subdivision_num_points,
                                 use_pallas=True, compute_dtype=jnp.bfloat16):
    """Eval forward of PointRendSemSegHead (StandardPointHead, implicit=False)."""
    sem = pred_logits
    N, C, H, W = pred_logits.shape
    num_points = min(H * W, subdivision_num_points)
    w_step = 1.0 / float(W)
    h_step = 1.0 / float(H)
    if use_pallas:
        packed = pack_point_head_params(params, features.shape[1])

    for _ in range(subdivision_steps):
        # calculate_uncertainty -> flat (N, H*W) map
        if use_pallas:
            flat_unc = calculate_uncertainty_pallas(sem)
        else:
            flat_unc = calculate_uncertainty_ref(sem).reshape(N, H * W)

        # get_uncertain_point_coords_on_grid
        _, point_indices = jax.lax.top_k(flat_unc, num_points)       # (N, P)
        px = w_step / 2.0 + (point_indices % W).astype(jnp.float32) * w_step
        py = h_step / 2.0 + (point_indices // W).astype(jnp.float32) * h_step
        point_coords = jnp.stack([px, py], axis=-1)                  # (N, P, 2)

        fine = point_sample(features, point_coords)                  # (N, Cf, P)
        coarse = point_sample(pred_logits, point_coords)             # (N, C,  P)

        if use_pallas:
            point_logits = point_head_pallas(
                fine, coarse, packed, out_dtype=sem.dtype,
                compute_dtype=compute_dtype)
        else:
            point_logits = point_head_ref(fine, coarse, params)

        # scatter point logits back into the logits map
        sem_flat = sem.reshape(N, C, H * W)
        n_idx = jnp.arange(N)[:, None, None]
        c_idx = jnp.arange(C)[None, :, None]
        p_idx = point_indices[:, None, :]
        sem_flat = sem_flat.at[n_idx, c_idx, p_idx].set(
            point_logits.astype(sem.dtype))
        sem = sem_flat.reshape(N, C, H, W)
    return sem


# --------------------------------- main --------------------------------------

if __name__ == "__main__":
    key = jax.random.PRNGKey(0)
    k = jax.random.split(key, 18)

    # small synthetic config
    N, C, H, W = 2, 4, 16, 16          # pred_logits: (N, num_classes, H, W)
    Cf, Hf, Wf = 6, 32, 32             # fine-grained features
    fc_dim = 32
    subdivision_steps = 2
    subdivision_num_points = 32

    pred_logits = jax.random.normal(k[0], (N, C, H, W), jnp.float32)
    features = jax.random.normal(k[1], (N, Cf, Hf, Wf), jnp.float32)

    # StandardPointHead params: 3 fc layers (Conv1d k=1) with coarse concat
    # each layer, then predictor.  Biases stored as (dim, 1).
    cin0 = Cf + C
    cin = fc_dim + C
    params = {
        "w0": 0.2 * jax.random.normal(k[2], (fc_dim, cin0), jnp.float32),
        "b0": 0.1 * jax.random.normal(k[3], (fc_dim, 1), jnp.float32),
        "w1": 0.2 * jax.random.normal(k[4], (fc_dim, cin), jnp.float32),
        "b1": 0.1 * jax.random.normal(k[5], (fc_dim, 1), jnp.float32),
        "w2": 0.2 * jax.random.normal(k[6], (fc_dim, cin), jnp.float32),
        "b2": 0.1 * jax.random.normal(k[7], (fc_dim, 1), jnp.float32),
        "wp": 0.2 * jax.random.normal(k[8], (C, cin), jnp.float32),
        "bp": 0.1 * jax.random.normal(k[9], (C, 1), jnp.float32),
    }

    # ---- end-to-end eval: Pallas (f32 compute) vs plain-JAX reference ------
    out = point_rend_sem_seg_head_eval(
        pred_logits, features, params,
        subdivision_steps, subdivision_num_points,
        use_pallas=True, compute_dtype=jnp.float32)
    out = jax.block_until_ready(out)

    ref = point_rend_sem_seg_head_eval(
        pred_logits, features, params,
        subdivision_steps, subdivision_num_points, use_pallas=False)
    ref = jax.block_until_ready(ref)

    assert out.shape == (N, C, H, W)
    np.testing.assert_allclose(np.asarray(out), np.asarray(ref),
                               rtol=1e-4, atol=1e-4)

    # ---- end-to-end with the default bf16 fast path (loose check) ----------
    out_fast = point_rend_sem_seg_head_eval(
        pred_logits, features, params,
        subdivision_steps, subdivision_num_points, use_pallas=True)
    out_fast = jax.block_until_ready(out_fast)
    assert out_fast.shape == (N, C, H, W)
    assert bool(jnp.all(jnp.isfinite(out_fast)))

    # ---- uncertainty kernel: group path (C % 8 == 0, butterfly merge) ------
    big_logits = jax.random.normal(k[12], (1, 24, 16, 24), jnp.float32)
    unc_p = jax.block_until_ready(calculate_uncertainty_pallas(big_logits))
    unc_r = calculate_uncertainty_ref(big_logits).reshape(1, 16 * 24)
    np.testing.assert_allclose(np.asarray(unc_p), np.asarray(unc_r),
                               rtol=1e-6, atol=1e-6)

    # ---- uncertainty kernel: group + tail path (C % 8 != 0) ----------------
    tail_logits = jax.random.normal(k[13], (2, 13, 8, 16), jnp.float32)
    unc_p = jax.block_until_ready(calculate_uncertainty_pallas(tail_logits))
    unc_r = calculate_uncertainty_ref(tail_logits).reshape(2, 8 * 16)
    np.testing.assert_allclose(np.asarray(unc_p), np.asarray(unc_r),
                               rtol=1e-6, atol=1e-6)

    # ---- uncertainty kernel: fori_loop path (many channel groups) ----------
    many_logits = jax.random.normal(k[14], (1, 72, 8, 16), jnp.float32)
    unc_p = jax.block_until_ready(calculate_uncertainty_pallas(many_logits))
    unc_r = calculate_uncertainty_ref(many_logits).reshape(1, 8 * 16)
    np.testing.assert_allclose(np.asarray(unc_p), np.asarray(unc_r),
                               rtol=1e-6, atol=1e-6)

    # ---- bf16 point-head matmul path smoke test -----------------------------
    packed = pack_point_head_params(params, Cf)
    fine_s = jax.random.normal(k[10], (N, Cf, 40), jnp.float32)
    coarse_s = jax.random.normal(k[11], (N, C, 40), jnp.float32)
    out_bf16 = point_head_pallas(fine_s, coarse_s, packed,
                                 out_dtype=jnp.float32,
                                 compute_dtype=jnp.bfloat16)
    out_bf16 = jax.block_until_ready(out_bf16)
    ref_pts = point_head_ref(fine_s, coarse_s, params)
    assert out_bf16.shape == (N, C, 40)
    assert bool(jnp.all(jnp.isfinite(out_bf16)))
    assert float(jnp.max(jnp.abs(out_bf16 - ref_pts))) < 1.0   # loose bf16 bound

    print("KERNEL_OK")
</pallas_src>

<mosaic_0001>
module attributes {stable_mosaic.version = 11 : i64} {
  func.func @_uncertainty_kernel(%arg0: i32, %arg1: i32, %arg2: memref<1x4x256xf32, #tpu.memory_space<vmem>>, %arg3: memref<1x1x256xf32, #tpu.memory_space<vmem>>) attributes {dimension_semantics = [#tpu.dimension_semantics<parallel>, #tpu.dimension_semantics<parallel>], iteration_bounds = array<i64: 2, 1>, scalar_prefetch = 0 : i64, scratch_operands = 0 : i64, tpu.core_type = #tpu.core_type<tc>, window_params = [{transform_indices = @transform_0, window_bounds = array<i64: 1, 4, 256>}, {transform_indices = @transform_1, window_bounds = array<i64: 1, 1, 256>}]} {
    %c0 = arith.constant 0 : index
    %c0_0 = arith.constant 0 : index
    %c0_1 = arith.constant 0 : index
    %0 = vector.load %arg2[%c0, %c0_0, %c0_1] : memref<1x4x256xf32, #tpu.memory_space<vmem>>, vector<1x1x256xf32>
    %1 = vector.shape_cast %0 : vector<1x1x256xf32> to vector<1x256xf32>
    %cst = arith.constant 0xFF800000 : f32
    %2 = vector.broadcast %cst : f32 to vector<1x256xf32>
    %c0_2 = arith.constant 0 : index
    %c1 = arith.constant 1 : index
    %c0_3 = arith.constant 0 : index
    %3 = vector.load %arg2[%c0_2, %c1, %c0_3] : memref<1x4x256xf32, #tpu.memory_space<vmem>>, vector<1x1x256xf32>
    %4 = vector.shape_cast %3 : vector<1x1x256xf32> to vector<1x256xf32>
    %5 = arith.maximumf %1, %4 : vector<1x256xf32>
    %6 = arith.minimumf %1, %4 : vector<1x256xf32>
    %7 = arith.maximumf %2, %6 : vector<1x256xf32>
    %c0_4 = arith.constant 0 : index
    %c2 = arith.constant 2 : index
    %c0_5 = arith.constant 0 : index
    %8 = vector.load %arg2[%c0_4, %c2, %c0_5] : memref<1x4x256xf32, #tpu.memory_space<vmem>>, vector<1x1x256xf32>
    %9 = vector.shape_cast %8 : vector<1x1x256xf32> to vector<1x256xf32>
    %10 = arith.maximumf %5, %9 : vector<1x256xf32>
    %11 = arith.minimumf %5, %9 : vector<1x256xf32>
    %12 = arith.maximumf %7, %11 : vector<1x256xf32>
    %c0_6 = arith.constant 0 : index
    %c3 = arith.constant 3 : index
    %c0_7 = arith.constant 0 : index
    %13 = vector.load %arg2[%c0_6, %c3, %c0_7] : memref<1x4x256xf32, #tpu.memory_space<vmem>>, vector<1x1x256xf32>
    %14 = vector.shape_cast %13 : vector<1x1x256xf32> to vector<1x256xf32>
    %15 = arith.maximumf %10, %14 : vector<1x256xf32>
    %16 = arith.minimumf %10, %14 : vector<1x256xf32>
    %17 = arith.maximumf %12, %16 : vector<1x256xf32>
    %18 = arith.subf %17, %15 : vector<1x256xf32>
    %c0_8 = arith.constant 0 : index
    %c0_9 = arith.constant 0 : index
    %c0_10 = arith.constant 0 : index
    %19 = vector.load %arg3[%c0_8, %c0_9, %c0_10] : memref<1x1x256xf32, #tpu.memory_space<vmem>>, vector<1x1x256xf32>
    %20 = vector.shape_cast %19 : vector<1x1x256xf32> to vector<1x256xf32>
    %21 = vector.shape_cast %18 : vector<1x256xf32> to vector<1x1x256xf32>
    tpu.vector_store %arg3[%c0_8, %c0_9, %c0_10], %21 {strides = array<i32>} : memref<1x1x256xf32, #tpu.memory_space<vmem>>, vector<1x1x256xf32>,
    return
  }
  func.func @transform_0(%arg0: i32, %arg1: i32) -> (i32, i32, i32) {
    %c0_i32 = arith.constant 0 : i32
    %c0_i32_0 = arith.constant 0 : i32
    return %arg0, %c0_i32, %arg1 : i32, i32, i32
  }
  func.func @transform_1(%arg0: i32, %arg1: i32) -> (i32, i32, i32) {
    %c0_i32 = arith.constant 0 : i32
    %c0_i32_0 = arith.constant 0 : i32
    return %arg0, %c0_i32, %arg1 : i32, i32, i32
  }
}

</mosaic_0001>

<bundles_post_ra>
// kernel: tpu_custom_call.1
= control target key start
LH: loop header
LB: loop body
LE: loop exit
PB: predicated region body
PF: predicated region fallthrough
CT: control target
= control target key end

     0   :  { %6 = vsyncpa [#allocation3], 0  ;;  %s614_s0 = inlined_call_operand.hbm [shape: f32[2,4,256], index: 0, kind: input, shape index: {}]   ;;  %s615_s1 = inlined_call_operand.hbm [shape: f32[2,1,256], index: 1, kind: output, shape index: {}]  }
   0x1   :  { %8 = vsyncpa [#allocation3 + $0x1], 0 }
   0x2   :  { %9 = vsyncpa [#allocation4], 0 }
   0x3   :  { %11 = vsyncpa [#allocation4 + $0x1], 0  ;;  %s479_s6 = smov 0   ;;  %s481_s7 = smov 0  }
   0x4   :  { %s483_s8 = smov 0   ;;  %s485_s9 = smov 0  }
   0x5   :  { %s487_s10 = smov 0   ;;  %s489_s11 = smov 0  }
   0x6 LB: > { %s275_s12 = sadd.s32 4294967295, %s465_s11   ;;  %s276_s13 = sadd.s32 4294967294, %s465_s11   ;;  %s465_s11 = sphi %s489_s11, %s17_s11   ;;  %s461_s10 = sphi %s487_s10, %s627_s10   ;;  %s457_s9 = sphi %s485_s9, %s626_s9   ;;  %s453_s8 = sphi %s483_s8, %s625_s8   ;;  %s449_s7 = sphi %s481_s7, %s624_s7   ;;  %s445_s6 = sphi %s479_s6, %s623_s6  }
   0x7   : > { %s29_s14 = sadd.s32 1, %s461_s10  ;;  %s38_s15 = sadd.s32 1, %s453_s8 }
   0x8   : > { %p31_p0 = scmp.ge.s32.totalorder %s29_s14, 2  ;;  %p45_p1 = scmp.ne.s32.totalorder %s453_s8, %s449_s7 }
   0x9   : > { %p46_p2 = scmp.eq.s32.totalorder %s465_s11, 0  ;;  %p51_p3 = scmp.ne.s32.totalorder %s449_s7, %s445_s6 }
   0xa   : > { %s629_s14 = smov (%p31_p0, %s29_s14), 0  ;;  %p52_p5 = scmp.eq.s32.totalorder %s275_s12, 0 }
   0xb   : > { %p520_p4 = por %p46_p2, %p45_p1  ;;  %s33_s17 = ssub.s32 %s461_s10, %s629_s14 }
   0xc   : > { %p77_p6 = scmp.eq.s32.totalorder %s275_s12, 1  ;;  %p36_p7 = scmp.eq.s32.totalorder %s33_s17, 0 }
   0xd   : > { %p526_p8 = por %p52_p5, %p51_p3  ;;  %p83_p10 = scmp.eq.s32.totalorder %s276_s13, 1 }
   0xe   : > { %p530_p9 = por %p77_p6, %p45_p1  ;;  %p307_p13 = scmp.lt.s32.totalorder %s465_s11, 2 }
   0xf   : > { %s535_s20 = scalar_select %p36_p7, %s453_s8, %s38_s15  }
  0x10   : > { %p537_p11 = por %p83_p10, %p51_p3  ;;  %s103_s22 = sand.u32 1, %s453_s8  }
  0x11   : > { %s279_s23 = sshll.u32 %s103_s22, 3  ;;  %s293_s24 = sshll.u32 %s461_s10, 7 }
  0x12   : > { %s619_s21 = scalar_select %p537_p11, 1, 0 }
  0x13   : > { %s115_s27 = scalar_lea.hbm %s614_s0, %s293_s24  ;;  %s107_s28 = scalar_lea.vmem [#allocation2], %s279_s23 }
  0x14   : > { %s117_s29 = sshll.u32 %s107_s28, 4  ;;  %p550_p0 = pnand %p307_p13, %p520_p4  ;;  %s118_s29 = int_to_ptr.vmem [resolvable:$true] %s117_s29 }
  0x15   : > { %p282_p1 = scmp.ge.s32.totalorder %s465_s11, 1  ;;  %p122_p2 = scmp.lt.s32.totalorder %s465_s11, 3 }
  0x16   : > { %s104_s2 = scalar_lea.sflag [#allocation3], %s103_s22  ;;  %p359_p3 = pneg %p550_p0 }
  0x17   : > { %s370_s3 = scalar_lea.vmem %s118_s29, 128  ;;  %s467_s4 = smov [#allocation2]  }
  0x18   : > { %p371_p5 = scmp.ne.s32.totalorder %s118_s29, %s370_s3  ;;  %s375_s5 = sshll.u32 %s467_s4, 4  ;;  %s376_s5 = int_to_ptr.vmem [resolvable:$false] %s375_s5 }
  0x19   : > { %s377_s12 = scalar_lea.vmem %s376_s5, 256  ;;  %p378_p10 = scmp.lt.s32.totalorder %s118_s29, %s376_s5 }
  0x1a   : > { %p373_p6 = pnand %p371_p5, %p359_p3  ;;  %p379_p12 = scmp.lt.s32.totalorder %s377_s12, %s370_s3 }
  0x1c   : > { %p374_p7 = pneg %p373_p6  ;;  %p380_p4 = por %p379_p12, %p378_p10 }
  0x1e   : > { %p381_p13 = pnand %p380_p4, %p374_p7 }
  0x20   : > { %384 = shalt.err (!%p381_p13)
}
  0x21   : > { %302 = dma.hbm_to_vmem [thread:$0]  (!%p550_p0), %s115_s27, 128, %s118_s29, %s104_s2  }
  0x22   : > { %p123_p11 = pnand %p282_p1, %p122_p2 }
  0x23   : > { %s565_s13 = sand.u32 (!%p123_p11), 1, %s449_s7  }
  0x24   : > { %126 = sbr.rel (%p123_p11) target bundleno = 67 (0x43), region = 24  ;;  %s283_s15 = sshll.u32 (!%p123_p11), %s565_s13, 3 }
  0x25   : > { %s129_s16 = scalar_lea.sflag (!%p123_p11), [#allocation3], %s565_s13  ;;  %s132_s17 = scalar_lea.vmem (!%p123_p11), [#allocation2], %s283_s15 }
  0x29   : > { %436 = dma.done.wait (%p526_p8), %s129_s16, 128  }
  0x2a   : > { %438 = vsyncadd (%p526_p8), %s129_s16, 4294967168  ;;  %s284_s22 = sshll.u32 %s565_s13, 1  ;;  %v153_v0 = vld [vmem:[%s132_s17] ss:$4 sm:$0x3]  ;;  %v169_v8 = vlaneseq  ;;  %s294_s24 = sshll.u32 %s457_s9, 5 }
  0x2b   : > { %v285_v1 = vld [vmem:[%s132_s17 + $0x1] ss:$4 sm:$0x3]  ;;  %v286_v4 = vld [vmem:[%s132_s17 + $0x2] ss:$4 sm:$0x3]  ;;  %s189_s27 = scalar_lea.hbm %s615_s1, %s294_s24 }
  0x2c   : > { %v156_v2 = vmax.f32 %v153_v0, %v285_v1  ;;  %v157_v3 = vmin.f32 %v153_v0, %v285_v1  ;;  %v287_v5 = vld [vmem:[%s132_s17 + $0x3] ss:$4 sm:$0x3]  ;;  %s150_s23 = scalar_lea.vmem [#allocation5], %s284_s22  ;;  %vm171_vm0 = vcmp.lt.s32.totalorder %v169_v8, 256  ;;  %s175_s28 = scalar_lea.sflag [#allocation4], %s565_s13 }
  0x2d   : > { %s191_s18 = sshll.u32 %s150_s23, 4  ;;  %s468_s30 = smov [#allocation5]   ;;  %s192_s18 = int_to_ptr.vmem [resolvable:$true] %s191_s18 }
  0x2e   : > { %v160_v6 = vmax.f32 %v156_v2, %v286_v4  ;;  %v161_v7 = vmin.f32 %v156_v2, %v286_v4  ;;  %s385_s29 = scalar_lea.vmem %s192_s18, 32  ;;  %s389_s2 = sshll.u32 %s468_s30, 4  ;;  %s390_s2 = int_to_ptr.vmem [resolvable:$false] %s389_s2 }
  0x2f   : > { %p386_p8 = scmp.ne.s32.totalorder %s192_s18, %s385_s29  ;;  %s391_s3 = scalar_lea.vmem %s390_s2, 64 }
  0x30   : > { %v162_v9 = vmax.f32 %v157_v3, %v161_v7  ;;  %v165_v10 = vmax.f32 %v160_v6, %v287_v5  ;;  %v166_v11 = vmin.f32 %v160_v6, %v287_v5  ;;  %p392_p0 = scmp.lt.s32.totalorder %s192_s18, %s390_s2  ;;  %p393_p1 = scmp.lt.s32.totalorder %s391_s3, %s385_s29 }
  0x31   : > { %p387_p11 = pnand %p386_p8, %p530_p9 }
  0x32   : > { %v167_v12 = vmax.f32 %v162_v9, %v166_v11  ;;  %p394_p2 = por %p393_p1, %p392_p0 }
  0x33   : > { %p388_p12 = pneg %p387_p11 }
  0x34   : > { %v168_v13 = vsub.f32 %v167_v12, %v165_v10 }
  0x35   : > { %p395_p3 = pnand %p394_p2, %p388_p12 }
  0x36   : > { %173 = vst.msk [vmem:[%s150_s23] sm:$0x3] %vm171_vm0, %v168_v13 }
  0x37   : > { %398 = shalt.err (!%p395_p3)
}
  0x38   : > { %s399_s9 = scalar_lea.hbm %s189_s27, 32  ;;  %s403_s12 = scalar_lea.hbm %s615_s1, 64 }
  0x39   : > { %p400_p5 = scmp.ne.s32.totalorder %s189_s27, %s399_s9  ;;  %p404_p10 = scmp.lt.s32.totalorder %s189_s27, %s615_s1 }
  0x3a   : > { %p405_p4 = scmp.lt.s32.totalorder %s403_s12, %s399_s9 }
  0x3b   : > { %p401_p6 = pnand %p400_p5, %p530_p9 }
  0x3c   : > { %p406_p13 = por %p405_p4, %p404_p10 }
  0x3d   : > { %p402_p7 = pneg %p401_p6 }
  0x3f   : > { %p407_p8 = pnand %p406_p13, %p402_p7 }
  0x41   : > { %410 = shalt.err (!%p407_p8)
}
  0x42   : > { %297 = dma.vmem_to_hbm [thread:$0]  (%p530_p9), %s192_s18, 32, %s189_s27, %s175_s28  }
  0x43 PF: > { %s203_s16 = sand.u32 1, %s445_s6   ;;  %p621_p11 = scmp.ne.s32.totalorder %s619_s21, 0 }
  0x44   : > { %p622_p12 = scmp.ge.s32.totalorder %s465_s11, 2  ;;  %s204_s17 = scalar_lea.sflag [#allocation4], %s203_s16 }
  0x46   : > { %p304_p0 = pnand %p622_p12, %p621_p11 }
  0x48   : > { %p305_p1 = pneg %p304_p0 }
  0x4a   : > { %440 = dma.done.wait (%p305_p1), %s204_s17, 32  }
  0x4b   : > { %442 = vsyncadd (%p305_p1), %s204_s17, 4294967264  ;;  %s17_s11 = sadd.s32 1, %s465_s11   ;;  %s623_s6 = smov %s449_s7 }
  0x4c   : > { %p14_p2 = scmp.ge.s32.totalorder %s17_s11, 4   ;;  %s624_s7 = smov %s453_s8 }
  0x4d   : > { %s625_s8 = smov %s535_s20  ;;  %s626_s9 = smov %s461_s10 }
  0x4e   : > { %s627_s10 = smov %s629_s14  ;;  %16 = sbr.rel (!%p14_p2) target bundleno = 6 (0x6), region = 72 }
  0x53   :  { %209 = vsyncpa [#allocation3], 1 }
  0x54   :  { %211 = vsyncpa [#allocation3 + $0x1], 1 }
  0x55   :  { %212 = vsyncpa [#allocation4], 1 }
  0x56   :  { %214 = vsyncpa [#allocation4 + $0x1], 1 }

</bundles_post_ra>
